<compile_context>
chip_gen: v6e
topology: v6e:2x2x1
jax: 0.10.0
libtpu: 0.0.40
codegen_flags: <defaults>
</compile_context>

<pallas_src>
import jax
import jax.numpy as jnp
from jax.experimental import pallas as pl
from jax.experimental.pallas import tpu as pltpu

EPS = 1e-5  # nn.BatchNorm1d default eps


# ---------------------------------------------------------------------------
# Host-side helpers
# ---------------------------------------------------------------------------
def _round_up(x, m):
    return ((x + m - 1) // m) * m


def _pad_axis(a, target, axis):
    pad = target - a.shape[axis]
    if pad == 0:
        return a
    cfg = [(0, 0)] * a.ndim
    cfg[axis] = (0, pad)
    return jnp.pad(a, cfg)


def _full_spec(shape):
    """Grid-invariant whole-array block (weights / BN params / fused-path operands)."""
    nd = len(shape)
    return pl.BlockSpec(tuple(shape), lambda i, _nd=nd: (0,) * _nd)


def _vmem_limit_bytes():
    """Generation-aware scoped-VMEM limit (~3/4 of physical VMEM)."""
    cap = None
    try:
        info = pltpu.get_tpu_info()
        cap = getattr(info, "vmem_capacity_bytes", None)
    except Exception:
        cap = None
    if not cap:
        cap = 64 * 1024 * 1024  # conservative fallback (safe on every generation)
    return int(cap) * 3 // 4


def _choose_tile_b(B, N, Ep, cdt_size, vmem_limit):
    """Largest divisor of B whose tile fits ~half the VMEM budget, targeting
    >= 1024 rows (tile_b * N) per grid step (avoids tiny per-step matmuls/stores)."""
    # rough per-row live bytes in stages A/B: f32 h / two shifted copies / conv acc,
    # cdt 3-tap concat + double-buffered activation in/out blocks.
    per_row = Ep * (4 * 4 + 7 * cdt_size) + 512
    budget = max(int(vmem_limit * 0.5), per_row * N)
    max_rows = max(budget // per_row, N)
    best = 1
    for tb in range(1, B + 1):
        if B % tb == 0 and tb * N <= max_rows:
            best = tb
            if tb * N >= 1024:
                break
    return best


def _fits_fused(B, N, D, Ep, cdt_size, vmem_limit):
    """Whole-model-in-VMEM heuristic for the fully fused single-kernel path."""
    per_row = Ep * 4 * 6 + Ep * 3 * cdt_size + (D + Ep) * 4
    weights = (2 * 3 * Ep * Ep + D * Ep) * cdt_size + 6 * Ep * 4
    return B * N * per_row + weights < vmem_limit // 2


# ---------------------------------------------------------------------------
# In-kernel helpers
# ---------------------------------------------------------------------------
def _conv3(h_f32, w_ref, n_per_batch):
    """Conv1d(k=3, pad=1) over time as ONE MXU matmul with contraction 3*Ep.

    h_f32: (R, Ep) f32 activations, R = tile_b * N rows (time-major per batch).
    w_ref: (3*Ep, Ep) fused weights in the compute dtype, rows [w[k=0]; w[k=1]; w[k=2]].
    """
    cdt = w_ref.dtype
    r, _ = h_f32.shape
    # time index of each row inside its batch element
    t = jax.lax.broadcasted_iota(jnp.int32, (r, 1), 0) % n_per_batch
    # shifted copies via XLU roll + boundary mask (zero-padding semantics); the mask
    # also kills cross-batch / wrap-around rows.
    h_m1 = jnp.where(t == 0, 0.0, pltpu.roll(h_f32, shift=1, axis=0))          # h[t-1]
    h_p1 = jnp.where(t == n_per_batch - 1, 0.0,
                     pltpu.roll(h_f32, shift=r - 1, axis=0))                   # h[t+1]
    # lane-dense concat (Ep is a multiple of 128) -> single K=3*Ep matmul.
    taps = jnp.concatenate(
        [h_m1.astype(cdt), h_f32.astype(cdt), h_p1.astype(cdt)], axis=-1)      # (R, 3*Ep)
    return jnp.dot(taps, w_ref[...], preferred_element_type=jnp.float32)       # (R, Ep) f32


def _partial_stats(y):
    """Per-tile partial (sum, sum-of-squares) over rows -> (2, Ep) f32."""
    return jnp.concatenate(
        [jnp.sum(y, axis=0, keepdims=True),
         jnp.sum(y * y, axis=0, keepdims=True)], axis=0)


def _fold_affine(stats, g, be, inv_count):
    """XLA-side fold of partial stats + gamma/beta into per-channel (scale, shift)."""
    total = jnp.sum(stats, axis=0)                                   # (2, Ep)
    mean = total[0:1] * inv_count
    var = jnp.maximum(total[1:2] * inv_count - mean * mean, 0.0)
    scale = g * jax.lax.rsqrt(var + EPS)
    shift = be - mean * scale
    return jnp.concatenate([scale, shift], axis=0)                   # (2, Ep)


# ---------------------------------------------------------------------------
# Kernels
# ---------------------------------------------------------------------------
def _fused_kernel(x_ref, w_in_ref, b_in_ref, w1_ref, g1_ref, be1_ref,
                  w2_ref, g2_ref, be2_ref, o_ref):
    """Whole forward pass in one kernel (activations never leave VMEM)."""
    b, n, d = x_ref.shape
    e = o_ref.shape[-1]
    inv_count = 1.0 / float(b * n)

    x2 = x_ref[...].reshape(b * n, d).astype(w_in_ref.dtype)
    # pointwise in_conv == matmul; its bias does NOT cancel under BN (zero padding
    # of conv1 makes the bias contribution row-dependent).
    h = jnp.dot(x2, w_in_ref[...], preferred_element_type=jnp.float32) + b_in_ref[...]

    for w_ref, g_ref, be_ref in ((w1_ref, g1_ref, be1_ref), (w2_ref, g2_ref, be2_ref)):
        # conv bias dropped: per-channel constant cancels under training-mode BN.
        y = _conv3(h, w_ref, n)
        mean = jnp.sum(y, axis=0, keepdims=True) * inv_count
        var = jnp.maximum(jnp.sum(y * y, axis=0, keepdims=True) * inv_count
                          - mean * mean, 0.0)
        scale = g_ref[...] * jax.lax.rsqrt(var + EPS)
        shift = be_ref[...] - mean * scale
        h = jnp.maximum(y * scale + shift, 0.0)

    o_ref[...] = h[:, :e].reshape(b, n, e).astype(o_ref.dtype)


def _stage_a_kernel(x_ref, w_in_ref, b_in_ref, w1_ref, y_ref, stats_ref):
    """in_conv (k=1) + conv1 (k=3) + per-tile BN partial stats for layer 1."""
    tb, n, d = x_ref.shape
    ep = w_in_ref.shape[1]
    x2 = x_ref[...].reshape(tb * n, d).astype(w_in_ref.dtype)
    h0 = jnp.dot(x2, w_in_ref[...], preferred_element_type=jnp.float32) + b_in_ref[...]
    y = _conv3(h0, w1_ref, n)
    y_ref[...] = y.reshape(tb, n, ep).astype(y_ref.dtype)
    stats_ref[...] = _partial_stats(y).reshape(1, 2, ep)


def _stage_b_kernel(y_in_ref, aff_ref, w_ref, y_out_ref, stats_ref):
    """BN1+ReLU (folded affine) + conv2 + per-tile BN partial stats for layer 2."""
    tb, n, ep = y_in_ref.shape
    yp = y_in_ref[...].reshape(tb * n, ep).astype(jnp.float32)
    h = jnp.maximum(yp * aff_ref[0:1, :] + aff_ref[1:2, :], 0.0)
    y = _conv3(h, w_ref, n)
    y_out_ref[...] = y.reshape(tb, n, ep).astype(y_out_ref.dtype)
    stats_ref[...] = _partial_stats(y).reshape(1, 2, ep)


def _stage_c_kernel(y_ref, aff_ref, o_ref):
    """BN2+ReLU (folded affine) -> final (tile_b, N, E) f32 output (unpadded)."""
    tb, n, ep = y_ref.shape
    e = o_ref.shape[-1]
    y = y_ref[...].reshape(tb * n, ep).astype(jnp.float32)
    h = jnp.maximum(y * aff_ref[0:1, :] + aff_ref[1:2, :], 0.0)
    o_ref[...] = h[:, :e].reshape(tb, n, e).astype(o_ref.dtype)


# ---------------------------------------------------------------------------
# Host wrapper
# ---------------------------------------------------------------------------
def timecnn1d(x, params, *, compute_dtype=jnp.bfloat16, tile_b=None, fused=None):
    """x: (B, N, D) f32 -> (B, N, E) f32, matching TimeCNN1D.forward (training-mode BN).

    tile_b: batch tile for the tiled path (must divide B); None = auto-size from the
            generation-aware VMEM budget.  fused: None = auto (single kernel when the
            whole activation fits VMEM), True/False to force.
    """
    B, N, D = x.shape
    E = params['w_in'].shape[1]
    if params['w1'].shape[0] != 3:
        raise NotImplementedError("only kernel_size=3 (module default) is implemented")
    Ep = _round_up(E, 128)                       # lane-dense channel dim
    cdt = jnp.dtype(compute_dtype)
    f32 = jnp.float32
    vmem_limit = _vmem_limit_bytes()

    # One-time host-side parameter prep: pad E -> Ep, fuse the 3 taps into a
    # (3*Ep, Ep) matmul operand, cast conv weights to the MXU compute dtype.
    # Padded gamma/beta are zero so padded channels stay exactly 0 end to end.
    w_in = _pad_axis(params['w_in'], Ep, 1).astype(cdt)                         # (D, Ep)
    b_in = _pad_axis(params['b_in'].reshape(1, E), Ep, 1).astype(f32)           # (1, Ep)
    w1f = _pad_axis(_pad_axis(params['w1'], Ep, 1), Ep, 2).astype(cdt).reshape(3 * Ep, Ep)
    w2f = _pad_axis(_pad_axis(params['w2'], Ep, 1), Ep, 2).astype(cdt).reshape(3 * Ep, Ep)
    g1 = _pad_axis(params['g1'].reshape(1, E), Ep, 1).astype(f32)
    be1 = _pad_axis(params['be1'].reshape(1, E), Ep, 1).astype(f32)
    g2 = _pad_axis(params['g2'].reshape(1, E), Ep, 1).astype(f32)
    be2 = _pad_axis(params['be2'].reshape(1, E), Ep, 1).astype(f32)
    # NOTE: params['b1'] / params['b2'] intentionally unused: per-channel conv biases
    # cancel exactly under training-mode BatchNorm.

    conv_flops = int(2 * B * N * 3 * Ep * Ep)
    in_flops = int(2 * B * N * D * Ep)
    act_bytes = int(B * N * Ep * cdt.itemsize)
    w3_bytes = int(3 * Ep * Ep * cdt.itemsize)

    if fused is None:
        fused = _fits_fused(B, N, D, Ep, cdt.itemsize, vmem_limit)

    # ---- fully fused single-kernel path (no HBM activation round-trips) ----
    if fused:
        operands = (x, w_in, b_in, w1f, g1, be1, w2f, g2, be2)
        return pl.pallas_call(
            _fused_kernel,
            grid=(1,),
            in_specs=[_full_spec(a.shape) for a in operands],
            out_specs=_full_spec((B, N, E)),
            out_shape=jax.ShapeDtypeStruct((B, N, E), f32),
            compiler_params=pltpu.CompilerParams(
                dimension_semantics=("arbitrary",),
                vmem_limit_bytes=vmem_limit),
            cost_estimate=pl.CostEstimate(
                flops=in_flops + 2 * conv_flops, transcendentals=0,
                bytes_accessed=int(x.size * 4 + B * N * E * 4 + 2 * w3_bytes)),
        )(*operands)

    # ---- tiled 3-stage path ----
    if tile_b is None:
        tile_b = _choose_tile_b(B, N, Ep, cdt.itemsize, vmem_limit)
    if B % tile_b != 0:
        raise ValueError("tile_b must divide B")
    nb = B // tile_b
    inv_count = 1.0 / float(B * N)

    x_spec = pl.BlockSpec((tile_b, N, D), lambda i: (i, 0, 0))
    act_spec = pl.BlockSpec((tile_b, N, Ep), lambda i: (i, 0, 0))
    out_spec = pl.BlockSpec((tile_b, N, E), lambda i: (i, 0, 0))
    stats_spec = pl.BlockSpec((1, 2, Ep), lambda i: (i, 0, 0))     # per-tile partials
    aff_spec = pl.BlockSpec((2, Ep), lambda i: (0, 0))

    # Per-tile partial stats -> fully "parallel" grid (megacore-shardable on v7x).
    par = pltpu.CompilerParams(dimension_semantics=("parallel",),
                               vmem_limit_bytes=vmem_limit)

    # stage A: in_conv + conv1 + layer-1 partial stats
    y1, s1 = pl.pallas_call(
        _stage_a_kernel, grid=(nb,),
        in_specs=[x_spec, _full_spec(w_in.shape), _full_spec(b_in.shape),
                  _full_spec(w1f.shape)],
        out_specs=[act_spec, stats_spec],
        out_shape=[jax.ShapeDtypeStruct((B, N, Ep), cdt),
                   jax.ShapeDtypeStruct((nb, 2, Ep), f32)],
        compiler_params=par,
        cost_estimate=pl.CostEstimate(
            flops=in_flops + conv_flops, transcendentals=0,
            bytes_accessed=int(x.size * 4) + act_bytes + w3_bytes),
    )(x, w_in, b_in, w1f)
    aff1 = _fold_affine(s1, g1, be1, inv_count)          # tiny (2, Ep) XLA fold

    # stage B: BN1+ReLU (folded) + conv2 + layer-2 partial stats
    y2, s2 = pl.pallas_call(
        _stage_b_kernel, grid=(nb,),
        in_specs=[act_spec, aff_spec, _full_spec(w2f.shape)],
        out_specs=[act_spec, stats_spec],
        out_shape=[jax.ShapeDtypeStruct((B, N, Ep), cdt),
                   jax.ShapeDtypeStruct((nb, 2, Ep), f32)],
        compiler_params=par,
        cost_estimate=pl.CostEstimate(
            flops=conv_flops, transcendentals=0,
            bytes_accessed=2 * act_bytes + w3_bytes),
    )(y1, aff1, w2f)
    aff2 = _fold_affine(s2, g2, be2, inv_count)

    # stage C: BN2+ReLU (folded) -> unpadded (B, N, E) f32 output
    out = pl.pallas_call(
        _stage_c_kernel, grid=(nb,),
        in_specs=[act_spec, aff_spec],
        out_specs=out_spec,
        out_shape=jax.ShapeDtypeStruct((B, N, E), f32),
        compiler_params=par,
        cost_estimate=pl.CostEstimate(
            flops=int(3 * B * N * Ep), transcendentals=0,
            bytes_accessed=act_bytes + int(B * N * E * 4)),
    )(y2, aff2)
    return out


# ---------------------------------------------------------------------------
# Pure-JAX reference mimicking the PyTorch NCW code path exactly
# ---------------------------------------------------------------------------
def ref_forward(x, params):
    xt = jnp.transpose(x, (0, 2, 1))                            # (B, D, N)
    w_in = jnp.transpose(params['w_in'], (1, 0))[:, :, None]    # (E, D, 1) OIH
    h = jax.lax.conv_general_dilated(
        xt, w_in, (1,), 'VALID', dimension_numbers=('NCH', 'OIH', 'NCH'))
    h = h + params['b_in'].reshape(1, -1, 1)
    for l in ('1', '2'):
        w = jnp.transpose(params['w' + l], (2, 1, 0))           # (E_out, E_in, K)
        h = jax.lax.conv_general_dilated(
            h, w, (1,), [(1, 1)], dimension_numbers=('NCH', 'OIH', 'NCH'))
        h = h + params['b' + l].reshape(1, -1, 1)
        mean = jnp.mean(h, axis=(0, 2), keepdims=True)
        var = jnp.mean((h - mean) ** 2, axis=(0, 2), keepdims=True)
        h = ((h - mean) / jnp.sqrt(var + EPS)
             * params['g' + l].reshape(1, -1, 1)
             + params['be' + l].reshape(1, -1, 1))
        h = jnp.maximum(h, 0.0)
    return jnp.transpose(h, (0, 2, 1))


if __name__ == "__main__":
    # batch, seq, input_dim, embed_size, kernel_size (module defaults: k=3, 2 layers)
    B, N, D, E, K = 4, 16, 8, 64, 3
    key = jax.random.PRNGKey(0)
    ks = jax.random.split(key, 9)

    x = jax.random.normal(ks[0], (B, N, D), jnp.float32)
    params = {
        'w_in': 0.1 * jax.random.normal(ks[1], (D, E), jnp.float32),   # in_conv weight (D, E)
        'b_in': 0.1 * jax.random.normal(ks[2], (E,), jnp.float32),
        'w1': 0.1 * jax.random.normal(ks[3], (K, E, E), jnp.float32),  # w[k, c_in, c_out]
        'b1': 0.1 * jax.random.normal(ks[4], (E,), jnp.float32),
        'g1': 1.0 + 0.1 * jax.random.normal(ks[5], (E,), jnp.float32),
        'be1': 0.1 * jax.random.normal(ks[6], (E,), jnp.float32),
        'w2': 0.1 * jax.random.normal(ks[7], (K, E, E), jnp.float32),
        'b2': 0.1 * jax.random.normal(ks[8], (E,), jnp.float32),
        'g2': jnp.ones((E,), jnp.float32),
        'be2': jnp.zeros((E,), jnp.float32),
    }

    ref = ref_forward(x, params)
    fwd = jax.jit(timecnn1d, static_argnames=("compute_dtype", "tile_b", "fused"))

    # Default path: fused single kernel (activation fits VMEM), bf16 MXU compute.
    out_fused = fwd(x, params)
    jax.block_until_ready(out_fused)
    assert out_fused.shape == (B, N, E)
    assert jnp.allclose(out_fused, ref, atol=6e-2, rtol=6e-2), \
        "fused bf16 kernel mismatch vs reference"

    # Tiled 3-stage path, f32 compute, explicit small batch tile (2 grid steps).
    out_tiled_f32 = fwd(x, params, compute_dtype=jnp.float32, fused=False, tile_b=2)
    jax.block_until_ready(out_tiled_f32)
    assert out_tiled_f32.shape == (B, N, E)
    assert jnp.allclose(out_tiled_f32, ref, atol=1e-2, rtol=1e-2), \
        "tiled f32 kernel mismatch vs reference"

    # Tiled path, bf16 compute, auto-sized batch tile.
    out_tiled_bf16 = fwd(x, params, fused=False)
    jax.block_until_ready(out_tiled_bf16)
    assert out_tiled_bf16.shape == (B, N, E)
    assert jnp.allclose(out_tiled_bf16, ref, atol=6e-2, rtol=6e-2), \
        "tiled bf16 kernel mismatch vs reference"

    print("KERNEL_OK")
</pallas_src>

<mosaic_0001>
module attributes {stable_mosaic.version = 11 : i64} {
  func.func @_fused_kernel(%arg0: i32, %arg1: memref<4x16x8xf32, #tpu.memory_space<vmem>>, %arg2: memref<8x128xbf16, #tpu.memory_space<vmem>>, %arg3: memref<1x128xf32, #tpu.memory_space<vmem>>, %arg4: memref<384x128xbf16, #tpu.memory_space<vmem>>, %arg5: memref<1x128xf32, #tpu.memory_space<vmem>>, %arg6: memref<1x128xf32, #tpu.memory_space<vmem>>, %arg7: memref<384x128xbf16, #tpu.memory_space<vmem>>, %arg8: memref<1x128xf32, #tpu.memory_space<vmem>>, %arg9: memref<1x128xf32, #tpu.memory_space<vmem>>, %arg10: memref<4x16x64xf32, #tpu.memory_space<vmem>>) attributes {dimension_semantics = [#tpu.dimension_semantics<arbitrary>], iteration_bounds = array<i64: 1>, scalar_prefetch = 0 : i64, scratch_operands = 0 : i64, tpu.core_type = #tpu.core_type<tc>, window_params = [{pipeline_mode = #tpu.pipeline_mode<synchronous>, transform_indices = @transform_0, window_bounds = array<i64: 4, 16, 8>}, {pipeline_mode = #tpu.pipeline_mode<synchronous>, transform_indices = @transform_1, window_bounds = array<i64: 8, 128>}, {pipeline_mode = #tpu.pipeline_mode<synchronous>, transform_indices = @transform_2, window_bounds = array<i64: 1, 128>}, {pipeline_mode = #tpu.pipeline_mode<synchronous>, transform_indices = @transform_3, window_bounds = array<i64: 384, 128>}, {pipeline_mode = #tpu.pipeline_mode<synchronous>, transform_indices = @transform_4, window_bounds = array<i64: 1, 128>}, {pipeline_mode = #tpu.pipeline_mode<synchronous>, transform_indices = @transform_5, window_bounds = array<i64: 1, 128>}, {pipeline_mode = #tpu.pipeline_mode<synchronous>, transform_indices = @transform_6, window_bounds = array<i64: 384, 128>}, {pipeline_mode = #tpu.pipeline_mode<synchronous>, transform_indices = @transform_7, window_bounds = array<i64: 1, 128>}, {pipeline_mode = #tpu.pipeline_mode<synchronous>, transform_indices = @transform_8, window_bounds = array<i64: 1, 128>}, {pipeline_mode = #tpu.pipeline_mode<synchronous>, transform_indices = @transform_9, window_bounds = array<i64: 4, 16, 64>}]} {
    %c0 = arith.constant 0 : index
    %c0_0 = arith.constant 0 : index
    %c0_1 = arith.constant 0 : index
    %0 = vector.load %arg1[%c0, %c0_0, %c0_1] : memref<4x16x8xf32, #tpu.memory_space<vmem>>, vector<4x16x8xf32>
    %1 = vector.shape_cast %0 : vector<4x16x8xf32> to vector<64x8xf32>
    %2 = arith.truncf %1 : vector<64x8xf32> to vector<64x8xbf16>
    %c0_2 = arith.constant 0 : index
    %c0_3 = arith.constant 0 : index
    %3 = vector.load %arg2[%c0_2, %c0_3] : memref<8x128xbf16, #tpu.memory_space<vmem>>, vector<8x128xbf16>
    %cst = arith.constant dense<0.000000e+00> : vector<64x128xf32>
    %4 = tpu.matmul %2, %3, %cst {dimension_numbers = #tpu.dot_dimension_numbers<[1], [0], [0], [1], [0, 0, 1, 1], [], []>} : vector<64x8xbf16>, vector<8x128xbf16>, vector<64x128xf32> -> vector<64x128xf32>
    %c0_4 = arith.constant 0 : index
    %c0_5 = arith.constant 0 : index
    %5 = vector.load %arg3[%c0_4, %c0_5] : memref<1x128xf32, #tpu.memory_space<vmem>>, vector<1x128xf32>
    %6 = vector.broadcast %5 : vector<1x128xf32> to vector<64x128xf32>
    %7 = arith.addf %4, %6 : vector<64x128xf32>
    %8 = tpu.iota {dimensions = array<i32: 0>} : vector<64x1xi32>
    %c16_i32 = arith.constant 16 : i32
    %c0_i32 = arith.constant 0 : i32
    %9 = arith.cmpi eq, %c16_i32, %c0_i32 : i32
    %c1_i32 = arith.constant 1 : i32
    %10 = arith.select %9, %c1_i32, %c16_i32 : i32
    %11 = vector.broadcast %10 : i32 to vector<64x1xi32>
    %12 = arith.remsi %8, %11 : vector<64x1xi32>
    %c0_i32_6 = arith.constant 0 : i32
    %13 = vector.broadcast %c0_i32_6 : i32 to vector<64x1xi32>
    %14 = arith.cmpi ne, %12, %13 : vector<64x1xi32>
    %c0_i32_7 = arith.constant 0 : i32
    %15 = vector.broadcast %c0_i32_7 : i32 to vector<64x1xi32>
    %16 = arith.cmpi slt, %12, %15 : vector<64x1xi32>
    %c0_i32_8 = arith.constant 0 : i32
    %17 = arith.cmpi slt, %10, %c0_i32_8 : i32
    %18 = vector.broadcast %17 : i1 to vector<64x1xi1>
    %19 = vector.broadcast %18 : vector<64x1xi1> to vector<64x1xi1>
    %20 = arith.xori %16, %19 : vector<64x1xi1>
    %21 = arith.andi %20, %14 : vector<64x1xi1>
    %22 = vector.broadcast %10 : i32 to vector<64x1xi32>
    %23 = arith.addi %12, %22 : vector<64x1xi32>
    %24 = arith.select %21, %23, %12 : vector<64x1xi1>, vector<64x1xi32>
    %c0_i32_9 = arith.constant 0 : i32
    %25 = vector.broadcast %c0_i32_9 : i32 to vector<64x1xi32>
    %26 = arith.cmpi eq, %24, %25 : vector<64x1xi32>
    %c1_i32_10 = arith.constant 1 : i32
    %27 = tpu.dynamic_rotate %7 by %c1_i32_10 dim 0 : vector<64x128xf32>, i32 -> vector<64x128xf32>
    %cst_11 = arith.constant 0.000000e+00 : f32
    %28 = vector.shape_cast %26 : vector<64x1xi1> to vector<64x1xi1>
    %29 = vector.broadcast %28 : vector<64x1xi1> to vector<64x128xi1>
    %30 = vector.broadcast %cst_11 : f32 to vector<64x128xf32>
    %31 = arith.select %29, %30, %27 : vector<64x128xi1>, vector<64x128xf32>
    %c15_i32 = arith.constant 15 : i32
    %32 = vector.broadcast %c15_i32 : i32 to vector<64x1xi32>
    %33 = arith.cmpi eq, %24, %32 : vector<64x1xi32>
    %c63_i32 = arith.constant 63 : i32
    %34 = tpu.dynamic_rotate %7 by %c63_i32 dim 0 : vector<64x128xf32>, i32 -> vector<64x128xf32>
    %cst_12 = arith.constant 0.000000e+00 : f32
    %35 = vector.shape_cast %33 : vector<64x1xi1> to vector<64x1xi1>
    %36 = vector.broadcast %35 : vector<64x1xi1> to vector<64x128xi1>
    %37 = vector.broadcast %cst_12 : f32 to vector<64x128xf32>
    %38 = arith.select %36, %37, %34 : vector<64x128xi1>, vector<64x128xf32>
    %39 = arith.truncf %31 : vector<64x128xf32> to vector<64x128xbf16>
    %40 = arith.truncf %7 : vector<64x128xf32> to vector<64x128xbf16>
    %41 = arith.truncf %38 : vector<64x128xf32> to vector<64x128xbf16>
    %42 = tpu.concatenate %39, %40, %41 in 1 : vector<64x128xbf16>, vector<64x128xbf16>, vector<64x128xbf16> -> vector<64x384xbf16>
    %c0_13 = arith.constant 0 : index
    %c0_14 = arith.constant 0 : index
    %43 = vector.load %arg4[%c0_13, %c0_14] : memref<384x128xbf16, #tpu.memory_space<vmem>>, vector<384x128xbf16>
    %cst_15 = arith.constant dense<0.000000e+00> : vector<64x128xf32>
    %44 = tpu.matmul %42, %43, %cst_15 {dimension_numbers = #tpu.dot_dimension_numbers<[1], [0], [0], [1], [0, 0, 1, 1], [], []>} : vector<64x384xbf16>, vector<384x128xbf16>, vector<64x128xf32> -> vector<64x128xf32>
    %cst_16 = arith.constant dense<0.000000e+00> : vector<128xf32>
    %45 = vector.multi_reduction <add>, %44, %cst_16 [0] : vector<64x128xf32> to vector<128xf32>
    %46 = vector.shape_cast %45 : vector<128xf32> to vector<1x128xf32>
    %cst_17 = arith.constant 1.562500e-02 : f32
    %47 = vector.broadcast %cst_17 : f32 to vector<1x128xf32>
    %48 = arith.mulf %46, %47 : vector<1x128xf32>
    %49 = arith.mulf %44, %44 : vector<64x128xf32>
    %cst_18 = arith.constant dense<0.000000e+00> : vector<128xf32>
    %50 = vector.multi_reduction <add>, %49, %cst_18 [0] : vector<64x128xf32> to vector<128xf32>
    %51 = vector.shape_cast %50 : vector<128xf32> to vector<1x128xf32>
    %cst_19 = arith.constant 1.562500e-02 : f32
    %52 = vector.broadcast %cst_19 : f32 to vector<1x128xf32>
    %53 = arith.mulf %51, %52 : vector<1x128xf32>
    %54 = arith.mulf %48, %48 : vector<1x128xf32>
    %55 = arith.subf %53, %54 : vector<1x128xf32>
    %cst_20 = arith.constant 0.000000e+00 : f32
    %56 = vector.broadcast %cst_20 : f32 to vector<1x128xf32>
    %57 = arith.maximumf %55, %56 : vector<1x128xf32>
    %c0_21 = arith.constant 0 : index
    %c0_22 = arith.constant 0 : index
    %58 = vector.load %arg5[%c0_21, %c0_22] : memref<1x128xf32, #tpu.memory_space<vmem>>, vector<1x128xf32>
    %cst_23 = arith.constant 9.99999974E-6 : f32
    %59 = vector.broadcast %cst_23 : f32 to vector<1x128xf32>
    %60 = arith.addf %57, %59 : vector<1x128xf32>
    %61 = math.rsqrt %60 : vector<1x128xf32>
    %62 = arith.mulf %58, %61 : vector<1x128xf32>
    %c0_24 = arith.constant 0 : index
    %c0_25 = arith.constant 0 : index
    %63 = vector.load %arg6[%c0_24, %c0_25] : memref<1x128xf32, #tpu.memory_space<vmem>>, vector<1x128xf32>
    %64 = arith.mulf %48, %62 : vector<1x128xf32>
    %65 = arith.subf %63, %64 : vector<1x128xf32>
    %66 = vector.broadcast %62 : vector<1x128xf32> to vector<64x128xf32>
    %67 = arith.mulf %44, %66 : vector<64x128xf32>
    %68 = vector.broadcast %65 : vector<1x128xf32> to vector<64x128xf32>
    %69 = arith.addf %67, %68 : vector<64x128xf32>
    %cst_26 = arith.constant 0.000000e+00 : f32
    %70 = vector.broadcast %cst_26 : f32 to vector<64x128xf32>
    %71 = arith.maximumf %69, %70 : vector<64x128xf32>
    %72 = tpu.iota {dimensions = array<i32: 0>} : vector<64x1xi32>
    %c16_i32_27 = arith.constant 16 : i32
    %c0_i32_28 = arith.constant 0 : i32
    %73 = arith.cmpi eq, %c16_i32_27, %c0_i32_28 : i32
    %c1_i32_29 = arith.constant 1 : i32
    %74 = arith.select %73, %c1_i32_29, %c16_i32_27 : i32
    %75 = vector.broadcast %74 : i32 to vector<64x1xi32>
    %76 = arith.remsi %72, %75 : vector<64x1xi32>
    %c0_i32_30 = arith.constant 0 : i32
    %77 = vector.broadcast %c0_i32_30 : i32 to vector<64x1xi32>
    %78 = arith.cmpi ne, %76, %77 : vector<64x1xi32>
    %c0_i32_31 = arith.constant 0 : i32
    %79 = vector.broadcast %c0_i32_31 : i32 to vector<64x1xi32>
    %80 = arith.cmpi slt, %76, %79 : vector<64x1xi32>
    %c0_i32_32 = arith.constant 0 : i32
    %81 = arith.cmpi slt, %74, %c0_i32_32 : i32
    %82 = vector.broadcast %81 : i1 to vector<64x1xi1>
    %83 = vector.broadcast %82 : vector<64x1xi1> to vector<64x1xi1>
    %84 = arith.xori %80, %83 : vector<64x1xi1>
    %85 = arith.andi %84, %78 : vector<64x1xi1>
    %86 = vector.broadcast %74 : i32 to vector<64x1xi32>
    %87 = arith.addi %76, %86 : vector<64x1xi32>
    %88 = arith.select %85, %87, %76 : vector<64x1xi1>, vector<64x1xi32>
    %c0_i32_33 = arith.constant 0 : i32
    %89 = vector.broadcast %c0_i32_33 : i32 to vector<64x1xi32>
    %90 = arith.cmpi eq, %88, %89 : vector<64x1xi32>
    %c1_i32_34 = arith.constant 1 : i32
    %91 = tpu.dynamic_rotate %71 by %c1_i32_34 dim 0 : vector<64x128xf32>, i32 -> vector<64x128xf32>
    %cst_35 = arith.constant 0.000000e+00 : f32
    %92 = vector.shape_cast %90 : vector<64x1xi1> to vector<64x1xi1>
    %93 = vector.broadcast %92 : vector<64x1xi1> to vector<64x128xi1>
    %94 = vector.broadcast %cst_35 : f32 to vector<64x128xf32>
    %95 = arith.select %93, %94, %91 : vector<64x128xi1>, vector<64x128xf32>
    %c15_i32_36 = arith.constant 15 : i32
    %96 = vector.broadcast %c15_i32_36 : i32 to vector<64x1xi32>
    %97 = arith.cmpi eq, %88, %96 : vector<64x1xi32>
    %c63_i32_37 = arith.constant 63 : i32
    %98 = tpu.dynamic_rotate %71 by %c63_i32_37 dim 0 : vector<64x128xf32>, i32 -> vector<64x128xf32>
    %cst_38 = arith.constant 0.000000e+00 : f32
    %99 = vector.shape_cast %97 : vector<64x1xi1> to vector<64x1xi1>
    %100 = vector.broadcast %99 : vector<64x1xi1> to vector<64x128xi1>
    %101 = vector.broadcast %cst_38 : f32 to vector<64x128xf32>
    %102 = arith.select %100, %101, %98 : vector<64x128xi1>, vector<64x128xf32>
    %103 = arith.truncf %95 : vector<64x128xf32> to vector<64x128xbf16>
    %104 = arith.truncf %71 : vector<64x128xf32> to vector<64x128xbf16>
    %105 = arith.truncf %102 : vector<64x128xf32> to vector<64x128xbf16>
    %106 = tpu.concatenate %103, %104, %105 in 1 : vector<64x128xbf16>, vector<64x128xbf16>, vector<64x128xbf16> -> vector<64x384xbf16>
    %c0_39 = arith.constant 0 : index
    %c0_40 = arith.constant 0 : index
    %107 = vector.load %arg7[%c0_39, %c0_40] : memref<384x128xbf16, #tpu.memory_space<vmem>>, vector<384x128xbf16>
    %cst_41 = arith.constant dense<0.000000e+00> : vector<64x128xf32>
    %108 = tpu.matmul %106, %107, %cst_41 {dimension_numbers = #tpu.dot_dimension_numbers<[1], [0], [0], [1], [0, 0, 1, 1], [], []>} : vector<64x384xbf16>, vector<384x128xbf16>, vector<64x128xf32> -> vector<64x128xf32>
    %cst_42 = arith.constant dense<0.000000e+00> : vector<128xf32>
    %109 = vector.multi_reduction <add>, %108, %cst_42 [0] : vector<64x128xf32> to vector<128xf32>
    %110 = vector.shape_cast %109 : vector<128xf32> to vector<1x128xf32>
    %cst_43 = arith.constant 1.562500e-02 : f32
    %111 = vector.broadcast %cst_43 : f32 to vector<1x128xf32>
    %112 = arith.mulf %110, %111 : vector<1x128xf32>
    %113 = arith.mulf %108, %108 : vector<64x128xf32>
    %cst_44 = arith.constant dense<0.000000e+00> : vector<128xf32>
    %114 = vector.multi_reduction <add>, %113, %cst_44 [0] : vector<64x128xf32> to vector<128xf32>
    %115 = vector.shape_cast %114 : vector<128xf32> to vector<1x128xf32>
    %cst_45 = arith.constant 1.562500e-02 : f32
    %116 = vector.broadcast %cst_45 : f32 to vector<1x128xf32>
    %117 = arith.mulf %115, %116 : vector<1x128xf32>
    %118 = arith.mulf %112, %112 : vector<1x128xf32>
    %119 = arith.subf %117, %118 : vector<1x128xf32>
    %cst_46 = arith.constant 0.000000e+00 : f32
    %120 = vector.broadcast %cst_46 : f32 to vector<1x128xf32>
    %121 = arith.maximumf %119, %120 : vector<1x128xf32>
    %c0_47 = arith.constant 0 : index
    %c0_48 = arith.constant 0 : index
    %122 = vector.load %arg8[%c0_47, %c0_48] : memref<1x128xf32, #tpu.memory_space<vmem>>, vector<1x128xf32>
    %cst_49 = arith.constant 9.99999974E-6 : f32
    %123 = vector.broadcast %cst_49 : f32 to vector<1x128xf32>
    %124 = arith.addf %121, %123 : vector<1x128xf32>
    %125 = math.rsqrt %124 : vector<1x128xf32>
    %126 = arith.mulf %122, %125 : vector<1x128xf32>
    %c0_50 = arith.constant 0 : index
    %c0_51 = arith.constant 0 : index
    %127 = vector.load %arg9[%c0_50, %c0_51] : memref<1x128xf32, #tpu.memory_space<vmem>>, vector<1x128xf32>
    %128 = arith.mulf %112, %126 : vector<1x128xf32>
    %129 = arith.subf %127, %128 : vector<1x128xf32>
    %130 = vector.broadcast %126 : vector<1x128xf32> to vector<64x128xf32>
    %131 = arith.mulf %108, %130 : vector<64x128xf32>
    %132 = vector.broadcast %129 : vector<1x128xf32> to vector<64x128xf32>
    %133 = arith.addf %131, %132 : vector<64x128xf32>
    %cst_52 = arith.constant 0.000000e+00 : f32
    %134 = vector.broadcast %cst_52 : f32 to vector<64x128xf32>
    %135 = arith.maximumf %133, %134 : vector<64x128xf32>
    %136 = vector.extract_strided_slice %135 {offsets = [0, 0], sizes = [64, 64], strides = [1, 1]} : vector<64x128xf32> to vector<64x64xf32>
    %137 = vector.shape_cast %136 : vector<64x64xf32> to vector<4x16x64xf32>
    %c0_53 = arith.constant 0 : index
    %c0_54 = arith.constant 0 : index
    %c0_55 = arith.constant 0 : index
    %138 = vector.load %arg10[%c0_53, %c0_54, %c0_55] : memref<4x16x64xf32, #tpu.memory_space<vmem>>, vector<4x16x64xf32>
    tpu.vector_store %arg10[%c0_53, %c0_54, %c0_55], %137 {strides = array<i32>} : memref<4x16x64xf32, #tpu.memory_space<vmem>>, vector<4x16x64xf32>,
    return
  }
  func.func @transform_0(%arg0: i32) -> (i32, i32, i32) {
    %c0_i32 = arith.constant 0 : i32
    %c0_i32_0 = arith.constant 0 : i32
    %c0_i32_1 = arith.constant 0 : i32
    %c0_i32_2 = arith.constant 0 : i32
    return %c0_i32, %c0_i32_0, %c0_i32_1 : i32, i32, i32
  }
  func.func @transform_1(%arg0: i32) -> (i32, i32) {
    %c0_i32 = arith.constant 0 : i32
    %c0_i32_0 = arith.constant 0 : i32
    %c0_i32_1 = arith.constant 0 : i32
    return %c0_i32, %c0_i32_0 : i32, i32
  }
  func.func @transform_2(%arg0: i32) -> (i32, i32) {
    %c0_i32 = arith.constant 0 : i32
    %c0_i32_0 = arith.constant 0 : i32
    %c0_i32_1 = arith.constant 0 : i32
    return %c0_i32, %c0_i32_0 : i32, i32
  }
  func.func @transform_3(%arg0: i32) -> (i32, i32) {
    %c0_i32 = arith.constant 0 : i32
    %c0_i32_0 = arith.constant 0 : i32
    %c0_i32_1 = arith.constant 0 : i32
    return %c0_i32, %c0_i32_0 : i32, i32
  }
  func.func @transform_4(%arg0: i32) -> (i32, i32) {
    %c0_i32 = arith.constant 0 : i32
    %c0_i32_0 = arith.constant 0 : i32
    %c0_i32_1 = arith.constant 0 : i32
    return %c0_i32, %c0_i32_0 : i32, i32
  }
  func.func @transform_5(%arg0: i32) -> (i32, i32) {
    %c0_i32 = arith.constant 0 : i32
    %c0_i32_0 = arith.constant 0 : i32
    %c0_i32_1 = arith.constant 0 : i32
    return %c0_i32, %c0_i32_0 : i32, i32
  }
  func.func @transform_6(%arg0: i32) -> (i32, i32) {
    %c0_i32 = arith.constant 0 : i32
    %c0_i32_0 = arith.constant 0 : i32
    %c0_i32_1 = arith.constant 0 : i32
    return %c0_i32, %c0_i32_0 : i32, i32
  }
  func.func @transform_7(%arg0: i32) -> (i32, i32) {
    %c0_i32 = arith.constant 0 : i32
    %c0_i32_0 = arith.constant 0 : i32
    %c0_i32_1 = arith.constant 0 : i32
    return %c0_i32, %c0_i32_0 : i32, i32
  }
  func.func @transform_8(%arg0: i32) -> (i32, i32) {
    %c0_i32 = arith.constant 0 : i32
    %c0_i32_0 = arith.constant 0 : i32
    %c0_i32_1 = arith.constant 0 : i32
    return %c0_i32, %c0_i32_0 : i32, i32
  }
  func.func @transform_9(%arg0: i32) -> (i32, i32, i32) {
    %c0_i32 = arith.constant 0 : i32
    %c0_i32_0 = arith.constant 0 : i32
    %c0_i32_1 = arith.constant 0 : i32
    %c0_i32_2 = arith.constant 0 : i32
    return %c0_i32, %c0_i32_0, %c0_i32_1 : i32, i32, i32
  }
}

</mosaic_0001>

<bundles_post_ra>
// kernel: timecnn1d.1
= control target key start
LH: loop header
LB: loop body
LE: loop exit
PB: predicated region body
PF: predicated region fallthrough
CT: control target
= control target key end

     0   :  { %vm67_vm0 = vcmask 1043456   ;;  %vm54_vm1 = vcmask 64512   ;;  %s2138_s0 = inlined_call_operand.vmem [shape: f32[4,16,8], index: 0, kind: input, shape index: {}]   ;;  %s2139_s1 = inlined_call_operand.vmem [shape: bf16[8,128], index: 1, kind: input, shape index: {}]   ;;  %s2140_s2 = inlined_call_operand.vmem [shape: f32[1,128], index: 2, kind: input, shape index: {}]   ;;  %s2141_s3 = inlined_call_operand.vmem [shape: bf16[384,128], index: 3, kind: input, shape index: {}]   ;;  %s2142_s4 = inlined_call_operand.vmem [shape: f32[1,128], index: 4, kind: input, shape index: {}]   ;;  %s2143_s5 = inlined_call_operand.vmem [shape: f32[1,128], index: 5, kind: input, shape index: {}]   ;;  %s2144_s6 = inlined_call_operand.vmem [shape: bf16[384,128], index: 6, kind: input, shape index: {}]   ;;  %s2145_s7 = inlined_call_operand.vmem [shape: f32[1,128], index: 7, kind: input, shape index: {}]   ;;  %s2146_s8 = inlined_call_operand.vmem [shape: f32[1,128], index: 8, kind: input, shape index: {}]   ;;  %s2147_s9 = inlined_call_operand.hbm [shape: f32[4,16,64], index: 9, kind: output, shape index: {}]  }
   0x1   :  { %v46_v0 = vld [vmem:[%s2139_s1] sm:$0xf]  ;;  %v35_v2 = vld [vmem:[%s2138_s0 + $0x8] sm:$0xff]  ;;  %v36_v5 = vld [vmem:[%s2138_s0 + $0x10] sm:$0xff] }
   0x2   :  { %v34_v1 = vld [vmem:[%s2138_s0] sm:$0xff]  ;;  %1536 = vmatprep.subr.msk.bf16.mxu0 %vm67_vm0, %v46_v0  ;;  %v69_v3 = vsel %vm67_vm0, %v46_v0, 0  ;;  %v37_v6 = vld [vmem:[%s2138_s0 + $0x18] sm:$0xff]  ;;  %v39_v9 = vld [vmem:[%s2138_s0 + $0x28] sm:$0xff] }
   0x3   :  { %v42_v4 = vpack.c.bf16 %v35_v2, %v34_v1  ;;  %v38_v7 = vld [vmem:[%s2138_s0 + $0x20] sm:$0xff]  ;;  %1479 = vmatpush3.bf16.msra.mxu0 %v69_v3  ;;  %v43_v8 = vpack.c.bf16 %v37_v6, %v36_v5  ;;  %v1541_v11 = vld [vmem:[%s2141_s3 + $0xb8] sm:$0xff]   ;;  %v40_v12 = vld [vmem:[%s2138_s0 + $0x30] sm:$0xff] }
   0x4   :  { %v44_v10 = vpack.c.bf16 %v39_v9, %v38_v7  ;;  %v41_v13 = vld [vmem:[%s2138_s0 + $0x38] sm:$0xff]  ;;  %1488 = vmatprep.subr.bf16.mxu0 %v1541_v11  ;;  %v1544_v16 = vld [vmem:[%s2141_s3 + $0xb0] sm:$0xff]   ;;  %v1547_v20 = vld [vmem:[%s2141_s3 + $0xa8] sm:$0xff]  }
   0x5   :  { %1480 = vmatprep.mubr.msk.bf16.mxu0 %vm54_vm1, %v42_v4  ;;  %v1542_v14 = vld [vmem:[%s2141_s3 + $0x78] sm:$0xff]   ;;  %v1545_v17 = vld [vmem:[%s2141_s3 + $0x70] sm:$0xff]   ;;  %v45_v19 = vpack.c.bf16 %v41_v13, %v40_v12  ;;  %v1548_v21 = vld [vmem:[%s2141_s3 + $0x68] sm:$0xff]  }
   0x6   :  { %1481 = vmatmul.mubr.msk.bf16.vlgmr.msra.gmra.mxu0 %vm54_vm1, %v43_v8  ;;  %v1543_v15 = vld [vmem:[%s2141_s3 + $0x38] sm:$0xff]   ;;  %1374 = vmatprep.subr.bf16.mxu1 %v1542_v14  ;;  %v1546_v18 = vld [vmem:[%s2141_s3 + $0x30] sm:$0xff]   ;;  %v1549_v22 = vld [vmem:[%s2141_s3 + $0x28] sm:$0xff]  }
   0x7   :  { %1484 = vmatprep.mubr.msk.bf16.mxu0 %vm54_vm1, %v44_v10  ;;  %1489 = vmatpush3.bf16.msra.mxu0 %v1541_v11  ;;  %v1550_v23 = vld [vmem:[%s2141_s3 + $0xa0] sm:$0xff]  }
   0x8   :  { %1375 = vmatpush3.bf16.msra.mxu1 %v1543_v15  ;;  %1490 = vmatprep.subr.bf16.mxu0 %v1544_v16 }
   0x9   :  { %1376 = vmatprep.subr.bf16.mxu1 %v1545_v17 }
   0xb   :  { %1491 = vmatpush3.bf16.msra.mxu0 %v1544_v16 }
   0xc   :  { %1492 = vmatprep.subr.bf16.mxu0 %v1547_v20  ;;  %1377 = vmatpush3.bf16.msra.mxu1 %v1546_v18 }
   0xd   :  { %1378 = vmatprep.subr.bf16.mxu1 %v1548_v21 }
   0xe   :  { %1485 = vmatmul.mubr.msk.bf16.gmra.mxu0 %vm54_vm1, %v45_v19 }
   0xf   :  { %1493 = vmatpush3.bf16.msra.mxu0 %v1547_v20 }
  0x10   :  { %1494 = vmatprep.subr.bf16.mxu0 %v1550_v23  ;;  %1379 = vmatpush3.bf16.msra.mxu1 %v1549_v22 }
  0x13   :  { %1495 = vmatpush3.bf16.msra.mxu0 %v1550_v23 }
  0x14   :  { %14 = vsyncpa [#allocation3], 0  ;;  %v1551_v24 = vld [vmem:[%s2141_s3 + $0x60] sm:$0xff]   ;;  %v1553_v26 = vld [vmem:[%s2141_s3 + $0x98] sm:$0xff]   ;;  %v136_v38 = vlaneseq  ;;  %vm1615_vm5 = vmmov 1  }
  0x15   :  { %v1552_v25 = vld [vmem:[%s2141_s3 + $0x20] sm:$0xff]   ;;  %1380 = vmatprep.subr.bf16.mxu1 %v1551_v24  ;;  %1496 = vmatprep.subr.bf16.mxu0 %v1553_v26  ;;  %v1554_v27 = vld [vmem:[%s2141_s3 + $0x58] sm:$0xff]   ;;  %v1556_v29 = vld [vmem:[%s2141_s3 + $0x90] sm:$0xff]  }
  0x16   :  { %1381 = vmatpush3.bf16.msra.mxu1 %v1552_v25  ;;  %v1555_v28 = vld [vmem:[%s2141_s3 + $0x18] sm:$0xff]   ;;  %v1557_v30 = vld [vmem:[%s2141_s3 + $0x50] sm:$0xff]   ;;  %v1559_v32 = vld [vmem:[%s2141_s3 + $0x88] sm:$0xff]   ;;  %v1772_v39 = vshrl.u32 %v136_v38, 7 }
  0x17   :  { %1497 = vmatpush3.bf16.msra.mxu0 %v1553_v26  ;;  %1382 = vmatprep.subr.bf16.mxu1 %v1554_v27  ;;  %v1558_v31 = vld [vmem:[%s2141_s3 + $0x10] sm:$0xff]   ;;  %v1560_v33 = vld [vmem:[%s2141_s3 + $0x48] sm:$0xff]   ;;  %v1562_v35 = vld [vmem:[%s2141_s3 + $0x80] sm:$0xff]  }
  0x18   :  { %1498 = vmatprep.subr.bf16.mxu0 %v1556_v29  ;;  %v1561_v34 = vld [vmem:[%s2141_s3 + $0x8] sm:$0xff]   ;;  %v1563_v36 = vld [vmem:[%s2141_s3 + $0x40] sm:$0xff]   ;;  %v138_v41 = vadd.s32 8, %v1772_v39  ;;  %v140_v44 = vadd.s32 24, %v1772_v39  ;;  %v142_v54 = vadd.s32 40, %v1772_v39  ;;  %vm306_vm3 = vcmp.lt.s32.totalorder %v1772_v39, 7 }
  0x19   :  { %v1564_v37 = vld [vmem:[%s2141_s3] sm:$0xff]   ;;  %v149_v61 = vand.u32 15, %v1772_v39  ;;  %v144_v7 = vadd.s32 56, %v1772_v39  ;;  %vm257_vm7 = vcmp.lt.s32.totalorder %v1772_v39, 1  ;;  %v139_v15 = vadd.s32 16, %v1772_v39  ;;  %v1566_v1 = vld [vmem:[%s2144_s6 + $0x38] sm:$0xff]  }
  0x1a   :  { %1383 = vmatpush3.bf16.msra.mxu1 %v1555_v28  ;;  %v1244_v42 = vld [vmem:[%s2140_s2] ss:$0 sm:$0xff]  ;;  %v156_v47 = vand.u32 15, %v138_v41  ;;  %v170_v52 = vand.u32 15, %v140_v44  ;;  %v184_v6 = vand.u32 15, %v142_v54  ;;  %v141_v41 = vadd.s32 32, %v1772_v39 }
  0x1b   :  { %1499 = vmatpush3.bf16.msra.mxu0 %v1556_v29  ;;  %1384 = vmatprep.subr.bf16.mxu1 %v1557_v30  ;;  %vm1826_vm8 = vcmp.ne.s32.totalorder %v149_v61, 0  ;;  %v198_v23 = vand.u32 15, %v144_v7  ;;  %v163_v30 = vand.u32 15, %v139_v15  ;;  %v1571_v7 = vld [vmem:[%s2144_s6 + $0x68] sm:$0xff]   ;;  %v1578_v14 = vld [vmem:[%s2144_s6 + $0x18] sm:$0xff]  }
  0x1c   :  { %1500 = vmatprep.subr.bf16.mxu0 %v1559_v32  ;;  %vm1790_vm2 = vcmp.ne.s32.totalorder %v156_v47, 15  ;;  %vm1804_vm4 = vcmp.ne.s32.totalorder %v170_v52, 15  ;;  %vm1367_vm10 = vcmp.ne.s32.totalorder %v184_v6, 15  ;;  %vm1854_vm11 = vmpackc.low %vm1615_vm5, %vm1826_vm8  ;;  %v143_v52 = vadd.s32 48, %v1772_v39  ;;  %v1570_v6 = vld [vmem:[%s2144_s6 + $0xb0] sm:$0xff]   ;;  %v1579_v15 = vld [vmem:[%s2144_s6 + $0x98] sm:$0xff]  }
  0x1d   :  { %vm1815_vm6 = vmpackc.low %vm1790_vm2, %vm1615_vm5  ;;  %vm1368_vm13 = vcmp.ne.s32.totalorder %v198_v23, 15  ;;  %vm1362_vm14 = vcmp.ne.s32.totalorder %v163_v30, 0  ;;  %v1586_v23 = vld [vmem:[%s2144_s6 + $0x40] sm:$0xff]  }
  0x1e   :  { %1385 = vmatpush3.bf16.msra.mxu1 %v1558_v31  ;;  %vm1841_vm9 = vmpackc.low %vm1804_vm4, %vm1615_vm5  ;;  %v191_v57 = vand.u32 15, %v143_v52 }
  0x1f   :  { %1501 = vmatpush3.bf16.msra.mxu0 %v1559_v32  ;;  %1386 = vmatprep.subr.bf16.mxu1 %v1560_v33  ;;  %vm1867_vm12 = vmpackc.low %vm1367_vm10, %vm1615_vm5 }
  0x20   :  { %1502 = vmatprep.subr.bf16.mxu0 %v1562_v35  ;;  %vm1883_vm15 = vmpackc.low %vm1368_vm13, %vm1615_vm5  ;;  %vm1364_vm4 = vcmp.ne.s32.totalorder %v191_v57, 0 }
  0x21   :  { %vm1892_vm0 = vmpackc.low %vm1615_vm5, %vm1362_vm14 }
  0x22   :  { %1387 = vmatpush3.bf16.msra.mxu1 %v1561_v34  ;;  %vm1922_vm8 = vmpackc.low %vm1615_vm5, %vm1364_vm4 }
  0x23   :  { %1503 = vmatpush3.bf16.msra.mxu0 %v1562_v35  ;;  %1388 = vmatprep.subr.bf16.mxu1 %v1563_v36 }
  0x26   :  { %1389 = vmatpush3.bf16.msra.mxu1 %v1564_v37 }
  0xc6   :  { %v1482_v40 = vpop.f32.mrf.mxu0 }
  0xc7   :  { %v1779_v46 = vadd.f32 %v1482_v40, %v1244_v42 }
  0xc8   :  { %v105_v43 = vpop.f32.mrf.mxu0 }
  0xc9   :  { %v1781_v48 = vadd.f32 %v1244_v42, %v105_v43  ;;  %v300_v55 = vrot.slane %v1779_v46, 1  ;;  %v251_v36 = vrot.slane %v1779_v46, 7 }
  0xca   :  { %v1483_v45 = vpop.f32.mrf.mxu0 }
  0xcb   :  { %v1783_v50 = vadd.f32 %v1483_v45, %v1244_v42  ;;  %v298_v58 = vrot.slane %v1781_v48, 1  ;;  %v249_v12 = vrot.slane %v1781_v48, 7 }
  0xcc   :  { %v108_v49 = vpop.f32.mrf.mxu0 }
  0xcd   :  { %v1785_v51 = vadd.f32 %v1244_v42, %v108_v49  ;;  %v301_v62 = vrot.slane %v1783_v50, 1  ;;  %v344_v31 = vpack.c.bf16 %v1783_v50, %v1779_v46  ;;  %v252_v37 = vrot.slane %v1783_v50, 7 }
  0xce   :  { %v1486_v53 = vpop.f32.mrf.mxu0 }
  0xcf   :  { %v299_v56 = vrot.slane %v1785_v51, 1  ;;  %v343_v60 = vpack.c.bf16 %v1785_v51, %v1781_v48  ;;  %v1808_v2 = vadd.f32 %v1486_v53, %v1244_v42  ;;  %v250_v8 = vrot.slane %v1785_v51, 7 }
  0xd0   :  { %v121_v59 = vpop.f32.mrf.mxu0  ;;  %v311_v16 = vsel %vm306_vm3, %v300_v55, %v301_v62  ;;  %v262_v45 = vsel %vm257_vm7, %v251_v36, %v252_v37  ;;  %v177_v48 = vand.u32 15, %v141_v41 }
  0xd1   :  { %v1800_v63 = vadd.f32 %v1244_v42, %v121_v59  ;;  %v312_v0 = vsel %vm306_vm3, %v299_v56, %v300_v55  ;;  %575 = vmatprep.mubr.bf16.mxu1 %v343_v60  ;;  %v313_v4 = vsel %vm306_vm3, %v298_v58, %v299_v56  ;;  %v304_v21 = vrot.slane %v1808_v2, 1 }
  0xd2   :  { %v1487_v3 = vpop.f32.mrf.mxu0  ;;  %v1291_v11 = vpack.c.bf16 %v312_v0, %v313_v4  ;;  %v264_v26 = vsel %vm257_vm7, %v249_v12, %v250_v8  ;;  %v263_v43 = vsel %vm257_vm7, %v250_v8, %v251_v36  ;;  %vm1363_vm1 = vcmp.ne.s32.totalorder %v177_v48, 0  ;;  %v1565_v0 = vld [vmem:[%s2144_s6 + $0x78] sm:$0xff]   ;;  %v1569_v4 = vld [vmem:[%s2144_s6 + $0x30] sm:$0xff]   ;;  %v1572_v8 = vld [vmem:[%s2144_s6 + $0x28] sm:$0xff]  }
  0xd3   :  { %v302_v9 = vrot.slane %v1800_v63, 1  ;;  %v1822_v10 = vadd.f32 %v1487_v3, %v1244_v42  ;;  %v1279_v47 = vpack.c.bf16 %v262_v45, %v263_v43  ;;  %v253_v51 = vrot.slane %v1800_v63, 7  ;;  %vm1908_vm2 = vmpackc.low %vm1615_vm5, %vm1363_vm1  ;;  %1426 = vmatprep.subr.bf16.mxu1 %v1565_v0  ;;  %v1568_v3 = vld [vmem:[%s2144_s6 + $0x70] sm:$0xff]  }
  0xd4   :  { %v124_v13 = vpop.f32.mrf.mxu0  ;;  %1504 = vmatprep.mubr.msk.bf16.mxu0 %vm1815_vm6, %v1291_v11  ;;  %v255_v59 = vrot.slane %v1808_v2, 7  ;;  %v1575_v11 = vld [vmem:[%s2144_s6 + $0x20] sm:$0xff]  }
  0xd5   :  { %v310_v17 = vsel %vm306_vm3, %v301_v62, %v302_v9  ;;  %v256_v18 = vrot.slane %v1822_v10, 7  ;;  %v125_v19 = vadd.f32 %v1244_v42, %v124_v13  ;;  %v305_v24 = vrot.slane %v1822_v10, 1  ;;  %v1577_v13 = vld [vmem:[%s2144_s6 + $0x58] sm:$0xff]  }
  0xd6   :  { %v1295_v22 = vpack.c.bf16 %v310_v17, %v311_v16  ;;  %v261_v54 = vsel %vm257_vm7, %v252_v37, %v253_v51  ;;  %v1580_v16 = vld [vmem:[%s2144_s6 + $0x50] sm:$0xff]  }
  0xd7   :  { %v303_v25 = vrot.slane %v125_v19, 1  ;;  %v265_v27 = vsel %vm257_vm7, %v256_v18, %v249_v12  ;;  %v307_v38 = vsel %vm306_vm3, %v304_v21, %v305_v24  ;;  %v314_v40 = vsel %vm306_vm3, %v305_v24, %v298_v58  ;;  %v1576_v12 = vld [vmem:[%s2144_s6 + $0xa0] sm:$0xff]   ;;  %v1581_v17 = vld [vmem:[%s2144_s6 + $0x10] sm:$0xff]  }
  0xd8   :  { %1505 = vmatmul.mubr.msk.bf16.vlgmr.msra.gmra.mxu0 %vm1841_vm9, %v1295_v22  ;;  %v1275_v29 = vpack.c.bf16 %v264_v26, %v265_v27  ;;  %v1303_v44 = vpack.c.bf16 %v314_v40, %v307_v38  ;;  %v254_v49 = vrot.slane %v125_v19, 7  ;;  %v345_v50 = vpack.c.bf16 %v125_v19, %v1800_v63  ;;  %v1583_v19 = vld [vmem:[%s2144_s6 + $0x48] sm:$0xff]   ;;  %v1587_v24 = vld [vmem:[%s2144_s6] sm:$0xff]  }
  0xd9   :  { %v308_v32 = vsel %vm306_vm3, %v303_v25, %v304_v21  ;;  %v309_v33 = vsel %vm306_vm3, %v302_v9, %v303_v25  ;;  %v346_v58 = vpack.c.bf16 %v1822_v10, %v1808_v2  ;;  %v258_v61 = vsel %vm257_vm7, %v255_v59, %v256_v18  ;;  %v1567_v2 = vld [vmem:[%s2144_s6 + $0xb8] sm:$0xff]   ;;  %v1573_v9 = vld [vmem:[%s2144_s6 + $0xa8] sm:$0xff]   ;;  %v1574_v10 = vld [vmem:[%s2144_s6 + $0x60] sm:$0xff]  }
  0xda   :  { %1276 = vmatmul.mubr.msk.bf16.vlgmr.msra.gmra.mxu1 %vm1854_vm11, %v1275_v29  ;;  %v1299_v35 = vpack.c.bf16 %v308_v32, %v309_v33  ;;  %v260_v53 = vsel %vm257_vm7, %v253_v51, %v254_v49  ;;  %v259_v60 = vsel %vm257_vm7, %v254_v49, %v255_v59  ;;  %1512 = vmatprep.subr.bf16.mxu0 %v1567_v2  ;;  %v1582_v18 = vld [vmem:[%s2144_s6 + $0x90] sm:$0xff]   ;;  %v1584_v21 = vld [vmem:[%s2144_s6 + $0x8] sm:$0xff]   ;;  %v1588_v25 = vld [vmem:[%s2144_s6 + $0x80] sm:$0xff]  }
  0xdb   :  { %583 = vmatprep.mubr.bf16.mxu1 %v344_v31  ;;  %v1283_v56 = vpack.c.bf16 %v260_v53, %v261_v54  ;;  %v1287_v63 = vpack.c.bf16 %v258_v61, %v259_v60  ;;  %1427 = vmatpush3.bf16.msra.mxu1 %v1566_v1  ;;  %v1585_v22 = vld [vmem:[%s2144_s6 + $0x88] sm:$0xff]  }
  0xdc   :  { %1508 = vmatprep.mubr.msk.bf16.mxu0 %vm1867_vm12, %v1299_v35  ;;  %1513 = vmatpush3.bf16.msra.mxu0 %v1567_v2 }
  0xdd   :  { %1428 = vmatprep.subr.bf16.mxu1 %v1568_v3  ;;  %1514 = vmatprep.subr.bf16.mxu0 %v1570_v6 }
  0xdf   :  { %1429 = vmatpush3.bf16.msra.mxu1 %v1569_v4 }
  0xe0   :  { %1509 = vmatmul.mubr.msk.bf16.gmra.mxu0 %vm1883_vm15, %v1303_v44  ;;  %1430 = vmatprep.subr.bf16.mxu1 %v1571_v7 }
  0xe1   :  { %1515 = vmatpush3.bf16.msra.mxu0 %v1570_v6 }
  0xe2   :  { %1280 = vmatmul.mubr.msk.bf16.gmra.mxu1 %vm1892_vm0, %v1279_v47  ;;  %1516 = vmatprep.subr.bf16.mxu0 %v1573_v9 }
  0xe3   :  { %591 = vmatprep.mubr.bf16.mxu1 %v345_v50  ;;  %1431 = vmatpush3.bf16.msra.mxu1 %v1572_v8 }
  0xe4   :  { %1432 = vmatprep.subr.bf16.mxu1 %v1574_v10 }
  0xe5   :  { %1517 = vmatpush3.bf16.msra.mxu0 %v1573_v9 }
  0xe6   :  { %1518 = vmatprep.subr.bf16.mxu0 %v1576_v12 }
  0xe7   :  { %1433 = vmatpush3.bf16.msra.mxu1 %v1575_v11 }
  0xe8   :  { %1434 = vmatprep.subr.bf16.mxu1 %v1577_v13 }
  0xe9   :  { %1519 = vmatpush3.bf16.msra.mxu0 %v1576_v12 }
  0xea   :  { %1284 = vmatmul.mubr.msk.bf16.gmra.mxu1 %vm1908_vm2, %v1283_v56  ;;  %1520 = vmatprep.subr.bf16.mxu0 %v1579_v15 }
  0xeb   :  { %599 = vmatprep.mubr.bf16.mxu1 %v346_v58  ;;  %1435 = vmatpush3.bf16.msra.mxu1 %v1578_v14 }
  0xec   :  { %1436 = vmatprep.subr.bf16.mxu1 %v1580_v16 }
  0xed   :  { %1521 = vmatpush3.bf16.msra.mxu0 %v1579_v15 }
  0xee   :  { %1522 = vmatprep.subr.bf16.mxu0 %v1582_v18 }
  0xef   :  { %1437 = vmatpush3.bf16.msra.mxu1 %v1581_v17 }
  0xf0   :  { %1438 = vmatprep.subr.bf16.mxu1 %v1583_v19 }
  0xf1   :  { %1523 = vmatpush3.bf16.msra.mxu0 %v1582_v18 }
  0xf2   :  { %1288 = vmatmul.mubr.msk.bf16.gmra.mxu1 %vm1922_vm8, %v1287_v63  ;;  %1524 = vmatprep.subr.bf16.mxu0 %v1585_v22 }
  0xf3   :  { %1439 = vmatpush3.bf16.msra.mxu1 %v1584_v21 }
  0xf4   :  { %1440 = vmatprep.subr.bf16.mxu1 %v1586_v23 }
  0xf5   :  { %1525 = vmatpush3.bf16.msra.mxu0 %v1585_v22 }
  0xf6   :  { %1526 = vmatprep.subr.bf16.mxu0 %v1588_v25 }
  0xf7   :  { %1441 = vmatpush3.bf16.msra.mxu1 %v1587_v24 }
  0xf9   :  { %1527 = vmatpush3.bf16.msra.mxu0 %v1588_v25 }
 0x198   :  { %v1506_v26 = vpop.f32.mrf.mxu0 }
 0x19a   :  { %v1390_v27 = vpop.f32.mrf.mxu1  ;;  %v642_v29 = vpop.f32.mrf.mxu0 }
 0x19c   :  { %v1391_v30 = vpop.f32.mrf.mxu1  ;;  %v1507_v31 = vpop.f32.mrf.mxu0 }
 0x19d   :  { %v1392_v43 = vadd.f32 %v1391_v30, %v1390_v27 }
 0x19e   :  { %v1393_v32 = vpop.f32.mrf.mxu1  ;;  %v645_v35 = vpop.f32.mrf.mxu0 }
 0x19f   :  { %v2002_v51 = vadd.f32 %v1392_v43, %v642_v29 }
 0x1a0   :  { %v1394_v33 = vpop.f32.mrf.mxu1  ;;  %v1510_v38 = vpop.f32.mrf.mxu0 }
 0x1a1   :  { %v1395_v41 = vadd.f32 %v1394_v33, %v1393_v32  ;;  %v687_v60 = vmul.f32 %v2002_v51, %v2002_v51 }
 0x1a2   :  { %v1396_v36 = vpop.f32.mrf.mxu1  ;;  %v658_v47 = vpop.f32.mrf.mxu0 }
 0x1a3   :  { %v2000_v49 = vadd.f32 %v1395_v41, %v645_v35 }
 0x1a4   :  { %v1397_v37 = vpop.f32.mrf.mxu1  ;;  %v1511_v56 = vpop.f32.mrf.mxu0 }
 0x1a5   :  { %v1398_v45 = vadd.f32 %v1397_v37, %v1396_v36  ;;  %v688_v58 = vmul.f32 %v2000_v49, %v2000_v49  ;;  %v673_v63 = vadd.f32 %v2000_v49, %v2002_v51 }
 0x1a6   :  { %v1399_v40 = vpop.f32.mrf.mxu1  ;;  %v661_v3 = vpop.f32.mrf.mxu0 }
 0x1a7   :  { %v2004_v53 = vadd.f32 %v1506_v26, %v1398_v45  ;;  %v695_v6 = vadd.f32 %v688_v58, %v687_v60 }
 0x1a8   :  { %v1400_v44 = vpop.f32.mrf.mxu1 }
 0x1a9   :  { %v1401_v50 = vadd.f32 %v1400_v44, %v1399_v40  ;;  %v689_v0 = vmul.f32 %v2004_v53, %v2004_v53  ;;  %v674_v7 = vadd.f32 %v673_v63, %v2004_v53  ;;  %v2029_v63 = vsub.s32 0, %v1772_v39 }
 0x1aa   :  { %v1402_v48 = vpop.f32.mrf.mxu1 }
 0x1ab   :  { %v2008_v59 = vadd.f32 %v1507_v31, %v1401_v50  ;;  %v696_v11 = vadd.f32 %v695_v6, %v689_v0 }
 0x1ac   :  { %v1403_v52 = vpop.f32.mrf.mxu1 }
 0x1ad   :  { %v1404_v54 = vadd.f32 %v1403_v52, %v1402_v48  ;;  %v690_v8 = vmul.f32 %v2008_v59, %v2008_v59  ;;  %v675_v12 = vadd.f32 %v674_v7, %v2008_v59 }
 0x1ae   :  { %v1405_v57 = vpop.f32.mrf.mxu1 }
 0x1af   :  { %v2016_v1 = vadd.f32 %v1404_v54, %v658_v47  ;;  %v697_v16 = vadd.f32 %v696_v11, %v690_v8 }
 0x1b0   :  { %v1406_v61 = vpop.f32.mrf.mxu1 }
 0x1b1   :  { %v1407_v2 = vadd.f32 %v1406_v61, %v1405_v57  ;;  %v691_v13 = vmul.f32 %v2016_v1, %v2016_v1  ;;  %v676_v17 = vadd.f32 %v675_v12, %v2016_v1  ;;  %v712_v61 = vld [vmem:[%s2142_s4] sm:$0x1] }
 0x1b2   :  { %v1408_v4 = vpop.f32.mrf.mxu1 }
 0x1b3   :  { %v662_v9 = vadd.f32 %v1407_v2, %v661_v3  ;;  %v698_v22 = vadd.f32 %v697_v16, %v691_v13  ;;  %v716_v3 = vld [vmem:[%s2143_s5] sm:$0x1] }
 0x1b4   :  { %v1409_v10 = vpop.f32.mrf.mxu1 }
 0x1b5   :  { %v1410_v14 = vadd.f32 %v1409_v10, %v1408_v4  ;;  %v692_v18 = vmul.f32 %v662_v9, %v662_v9  ;;  %v677_v23 = vadd.f32 %v676_v17, %v662_v9 }
 0x1b6   :  { %v1411_v15 = vpop.f32.mrf.mxu1 }
 0x1b7   :  { %v667_v19 = vadd.f32 %v1510_v38, %v1410_v14  ;;  %v699_v26 = vadd.f32 %v698_v22, %v692_v18 }
 0x1b8   :  { %v1412_v21 = vpop.f32.mrf.mxu1 }
 0x1b9   :  { %v693_v24 = vmul.f32 %v667_v19, %v667_v19  ;;  %v1413_v25 = vadd.f32 %v1412_v21, %v1411_v15  ;;  %v678_v27 = vadd.f32 %v677_v23, %v667_v19 }
 0x1bb   :  { %v670_v29 = vadd.f32 %v1511_v56, %v1413_v25  ;;  %v700_v30 = vadd.f32 %v699_v26, %v693_v24 }
 0x1bd   :  { %v679_v31 = vadd.f32 %v678_v27, %v670_v29  ;;  %v694_v32 = vmul.f32 %v670_v29, %v670_v29 }
 0x1bf   :  { %v680_v33 = vrot.slane %v679_v31, 4  ;;  %v701_v35 = vadd.f32 %v700_v30, %v694_v32 }
 0x1c1   :  { %v681_v36 = vadd.f32 %v680_v33, %v679_v31  ;;  %v702_v37 = vrot.slane %v701_v35, 4 }
 0x1c3   :  { %v682_v40 = vrot.slane %v681_v36, 2  ;;  %v703_v41 = vadd.f32 %v702_v37, %v701_v35 }
 0x1c5   :  { %v683_v43 = vadd.f32 %v682_v40, %v681_v36  ;;  %v704_v44 = vrot.slane %v703_v41, 2 }
 0x1c7   :  { %v684_v38 = vrot.slane %v683_v43, 1  ;;  %v705_v45 = vadd.f32 %v704_v44, %v703_v41 }
 0x1c9   :  { %v685_v47 = vadd.f32 %v684_v38, %v683_v43  ;;  %v706_v48 = vrot.slane %v705_v45, 1 }
 0x1cb   :  { %v686_v50 = vmul.f32 0.015625, %v685_v47  ;;  %v707_v52 = vadd.f32 %v706_v48, %v705_v45 }
 0x1cd   :  { %v708_v54 = vmul.f32 0.015625, %v707_v52  ;;  %v709_v57 = vmul.f32 %v686_v50, %v686_v50 }
 0x1cf   :  { %v710_v56 = vsub.f32 %v708_v54, %v709_v57 }
 0x1d1   :  { %v711_v58 = vmax.f32 %v710_v56, 0.0 }
 0x1d3   :  { %v713_v60 = vadd.f32 1e-05, %v711_v58 }
 0x1d5   :  { %1589 = vrsqrt.f32 %v713_v60 }
 0x1e2   :  { %v1590_v0 = vpop.eup %1589 }
 0x1e3   :  { %v715_v2 = vmul.f32 %v1590_v0, %v712_v61 }
 0x1e5   :  { %v717_v4 = vmul.f32 %v715_v2, %v686_v50  ;;  %v723_v6 = vrot.slane %v715_v2, %v2029_v63 }
 0x1e7   :  { %v718_v7 = vsub.f32 %v716_v3, %v717_v4  ;;  %v732_v8 = vmul.f32 %v723_v6, %v670_v29  ;;  %v725_v11 = vmul.f32 %v723_v6, %v2002_v51  ;;  %v726_v12 = vmul.f32 %v723_v6, %v2000_v49 }
 0x1e8   :  { %v727_v13 = vmul.f32 %v723_v6, %v2004_v53  ;;  %v728_v14 = vmul.f32 %v723_v6, %v2008_v59  ;;  %v729_v15 = vmul.f32 %v723_v6, %v2016_v1  ;;  %v730_v16 = vmul.f32 %v723_v6, %v662_v9 }
 0x1e9   :  { %v737_v10 = vrot.slane %v718_v7, %v2029_v63  ;;  %v731_v17 = vmul.f32 %v723_v6, %v667_v19 }
 0x1eb   :  { %v746_v18 = vadd.f32 %v737_v10, %v732_v8  ;;  %v739_v21 = vadd.f32 %v737_v10, %v725_v11  ;;  %v740_v22 = vadd.f32 %v737_v10, %v726_v12  ;;  %v741_v23 = vadd.f32 %v737_v10, %v727_v13 }
 0x1ec   :  { %v742_v24 = vadd.f32 %v737_v10, %v728_v14  ;;  %v743_v25 = vadd.f32 %v737_v10, %v729_v15  ;;  %v744_v26 = vadd.f32 %v737_v10, %v730_v16  ;;  %v745_v27 = vadd.f32 %v737_v10, %v731_v17 }
 0x1ed   :  { %v754_v29 = vmax.f32 %v746_v18, 0.0  ;;  %v747_v51 = vmax.f32 %v739_v21, 0.0  ;;  %v748_v30 = vmax.f32 %v740_v22, 0.0  ;;  %v749_v49 = vmax.f32 %v741_v23, 0.0 }
 0x1ee   :  { %v750_v31 = vmax.f32 %v742_v24, 0.0  ;;  %v751_v53 = vmax.f32 %v743_v25, 0.0  ;;  %v752_v32 = vmax.f32 %v744_v26, 0.0  ;;  %v753_v59 = vmax.f32 %v745_v27, 0.0 }
 0x1ef   :  { %v762_v33 = vrot.slane %v754_v29, 7  ;;  %v755_v1 = vrot.slane %v747_v51, 7  ;;  %v756_v9 = vrot.slane %v748_v30, 7  ;;  %v807_v19 = vpack.c.bf16 %v748_v30, %v747_v51 }
 0x1f0   :  { %v779_v35 = vrot.slane %v747_v51, 1  ;;  %v780_v36 = vrot.slane %v748_v30, 1  ;;  %v781_v37 = vrot.slane %v749_v49, 1  ;;  %v782_v40 = vrot.slane %v750_v31, 1 }
 0x1f1   :  { %v769_v41 = vsel %vm257_vm7, %v755_v1, %v756_v9  ;;  %v770_v43 = vsel %vm257_vm7, %v762_v33, %v755_v1  ;;  %1039 = vmatprep.mubr.bf16.mxu1 %v807_v19  ;;  %v783_v44 = vrot.slane %v751_v53, 1  ;;  %v808_v38 = vpack.c.bf16 %v750_v31, %v749_v49 }
 0x1f2   :  { %v1331_v45 = vpack.c.bf16 %v769_v41, %v770_v43  ;;  %v792_v47 = vsel %vm306_vm3, %v780_v36, %v781_v37  ;;  %v793_v48 = vsel %vm306_vm3, %v779_v35, %v780_v36  ;;  %v791_v50 = vsel %vm306_vm3, %v781_v37, %v782_v40 }
 0x1f3   :  { %v1347_v52 = vpack.c.bf16 %v792_v47, %v793_v48  ;;  %v790_v54 = vsel %vm306_vm3, %v782_v40, %v783_v44  ;;  %v784_v57 = vrot.slane %v752_v32, 1  ;;  %v785_v56 = vrot.slane %v753_v59, 1 }
 0x1f4   :  { %1332 = vmatmul.mubr.msk.bf16.vlgmr.msra.gmra.mxu1 %vm1854_vm11, %v1331_v45  ;;  %v1351_v58 = vpack.c.bf16 %v790_v54, %v791_v50  ;;  %v757_v60 = vrot.slane %v749_v49, 7  ;;  %v758_v61 = vrot.slane %v750_v31, 7  ;;  %v786_v3 = vrot.slane %v754_v29, 1 }
 0x1f5   :  { %1528 = vmatprep.mubr.msk.bf16.mxu0 %vm1815_vm6, %v1347_v52  ;;  %1047 = vmatprep.mubr.bf16.mxu1 %v808_v38  ;;  %v788_v0 = vsel %vm306_vm3, %v784_v57, %v785_v56  ;;  %v789_v2 = vsel %vm306_vm3, %v783_v44, %v784_v57  ;;  %v809_v10 = vpack.c.bf16 %v752_v32, %v751_v53  ;;  %v759_v20 = vrot.slane %v751_v53, 7 }
 0x1f6   :  { %1529 = vmatmul.mubr.msk.bf16.vlgmr.msra.gmra.mxu0 %vm1841_vm9, %v1351_v58  ;;  %v1355_v4 = vpack.c.bf16 %v788_v0, %v789_v2  ;;  %v767_v28 = vsel %vm257_vm7, %v757_v60, %v758_v61  ;;  %v768_v6 = vsel %vm257_vm7, %v756_v9, %v757_v60  ;;  %v787_v5 = vsel %vm306_vm3, %v785_v56, %v786_v3 }
 0x1f7   :  { %v794_v7 = vsel %vm306_vm3, %v786_v3, %v779_v35  ;;  %v1335_v8 = vpack.c.bf16 %v767_v28, %v768_v6  ;;  %v760_v11 = vrot.slane %v752_v32, 7  ;;  %v766_v13 = vsel %vm257_vm7, %v758_v61, %v759_v20 }
 0x1f8   :  { %1532 = vmatprep.mubr.msk.bf16.mxu0 %vm1867_vm12, %v1355_v4  ;;  %v1359_v12 = vpack.c.bf16 %v794_v7, %v787_v5  ;;  %v810_v15 = vpack.c.bf16 %v754_v29, %v753_v59  ;;  %v761_v16 = vrot.slane %v753_v59, 7  ;;  %vm1219_vm3 = vcmask 523264  }
 0x1f9   :  { %v765_v34 = vsel %vm257_vm7, %v759_v20, %v760_v11 }
 0x1fa   :  { %v1339_v14 = vpack.c.bf16 %v765_v34, %v766_v13  ;;  %v763_v46 = vsel %vm257_vm7, %v761_v16, %v762_v33  ;;  %v764_v42 = vsel %vm257_vm7, %v760_v11, %v761_v16 }
 0x1fb   :  { %v1343_v17 = vpack.c.bf16 %v763_v46, %v764_v42 }
 0x1fc   :  { %1336 = vmatmul.mubr.msk.bf16.gmra.mxu1 %vm1892_vm0, %v1335_v8 }
 0x1fd   :  { %1055 = vmatprep.mubr.bf16.mxu1 %v809_v10 }
 0x1fe   :  { %1533 = vmatmul.mubr.msk.bf16.gmra.mxu0 %vm1883_vm15, %v1359_v12 }
 0x204   :  { %1340 = vmatmul.mubr.msk.bf16.gmra.mxu1 %vm1908_vm2, %v1339_v14 }
 0x205   :  { %1063 = vmatprep.mubr.bf16.mxu1 %v810_v15 }
 0x20c   :  { %1344 = vmatmul.mubr.msk.bf16.gmra.mxu1 %vm1922_vm8, %v1343_v17 }
 0x2b4   :  { %v1442_v18 = vpop.f32.mrf.mxu1 }
 0x2b6   :  { %v1530_v21 = vpop.f32.mrf.mxu0  ;;  %v1443_v22 = vpop.f32.mrf.mxu1 }
 0x2b7   :  { %v1444_v31 = vadd.f32 %v1443_v22, %v1442_v18 }
 0x2b8   :  { %v1106_v23 = vpop.f32.mrf.mxu0  ;;  %v1445_v24 = vpop.f32.mrf.mxu1 }
 0x2b9   :  { %v2091_v1 = vadd.f32 %v1444_v31, %v1106_v23 }
 0x2ba   :  { %v1531_v25 = vpop.f32.mrf.mxu0  ;;  %v1446_v26 = vpop.f32.mrf.mxu1 }
 0x2bb   :  { %v1447_v49 = vadd.f32 %v1446_v26, %v1445_v24  ;;  %v1151_v43 = vmul.f32 %v2091_v1, %v2091_v1 }
 0x2bc   :  { %v1109_v55 = vpop.f32.mrf.mxu0  ;;  %v1448_v27 = vpop.f32.mrf.mxu1 }
 0x2bd   :  { %v2089_v62 = vadd.f32 %v1447_v49, %v1109_v55 }
 0x2be   :  { %v1449_v29 = vpop.f32.mrf.mxu1  ;;  %v1534_v51 = vpop.f32.mrf.mxu0 }
 0x2bf   :  { %v1450_v53 = vadd.f32 %v1449_v29, %v1448_v27  ;;  %v1152_v40 = vmul.f32 %v2089_v62, %v2089_v62  ;;  %v1137_v38 = vadd.f32 %v2089_v62, %v2091_v1 }
 0x2c0   :  { %v1451_v30 = vpop.f32.mrf.mxu1  ;;  %v1122_v32 = vpop.f32.mrf.mxu0 }
 0x2c1   :  { %v2093_v19 = vadd.f32 %v1530_v21, %v1450_v53  ;;  %v1159_v54 = vadd.f32 %v1152_v40, %v1151_v43 }
 0x2c2   :  { %v1452_v39 = vpop.f32.mrf.mxu1  ;;  %v1535_v36 = vpop.f32.mrf.mxu0 }
 0x2c3   :  { %v1453_v33 = vadd.f32 %v1452_v39, %v1451_v30  ;;  %v1153_v45 = vmul.f32 %v2093_v19, %v2093_v19  ;;  %v1138_v57 = vadd.f32 %v1137_v38, %v2093_v19 }
 0x2c4   :  { %v1454_v59 = vpop.f32.mrf.mxu1  ;;  %v1125_v50 = vpop.f32.mrf.mxu0 }
 0x2c5   :  { %v2097_v41 = vadd.f32 %v1531_v25, %v1453_v33  ;;  %v1160_v61 = vadd.f32 %v1159_v54, %v1153_v45 }
 0x2c6   :  { %v1455_v9 = vpop.f32.mrf.mxu1 }
 0x2c7   :  { %v1456_v35 = vadd.f32 %v1455_v9, %v1454_v59  ;;  %v1154_v56 = vmul.f32 %v2097_v41, %v2097_v41  ;;  %v1139_v0 = vadd.f32 %v1138_v57, %v2097_v41  ;;  %v1176_v59 = vld [vmem:[%s2145_s7] sm:$0x1]  ;;  %s1616_s7 = smov [#allocation2]  }
 0x2c8   :  { %v1457_v37 = vpop.f32.mrf.mxu1 }
 0x2c9   :  { %v2105_v47 = vadd.f32 %v1456_v35, %v1122_v32  ;;  %v1161_v28 = vadd.f32 %v1160_v61, %v1154_v56  ;;  %v1180_v35 = vld [vmem:[%s2146_s8] sm:$0x1]  ;;  %s1233_s8 = sshll.u32 %s1616_s7, 4  ;;  %s1234_s8 = int_to_ptr.vmem [resolvable:$true] %s1233_s8 }
 0x2ca   :  { %v1458_v44 = vpop.f32.mrf.mxu1  ;;  %s1593_s10 = scalar_lea.vmem %s1234_s8, 1024  ;;  %p1598_p1 = scmp.lt.s32.totalorder %s1234_s8, %s1234_s8 }
 0x2cb   :  { %v1459_v48 = vadd.f32 %v1458_v44, %v1457_v37  ;;  %v1155_v2 = vmul.f32 %v2105_v47, %v2105_v47  ;;  %v1140_v6 = vadd.f32 %v1139_v0, %v2105_v47  ;;  %p1594_p0 = scmp.ne.s32.totalorder %s1234_s8, %s1593_s10  ;;  %p1599_p2 = scmp.lt.s32.totalorder %s1593_s10, %s1593_s10 }
 0x2cc   :  { %v1460_v52 = vpop.f32.mrf.mxu1 }
 0x2cd   :  { %v1126_v58 = vadd.f32 %v1459_v48, %v1125_v50  ;;  %v1162_v10 = vadd.f32 %v1161_v28, %v1155_v2  ;;  %p1600_p3 = por %p1599_p2, %p1598_p1 }
 0x2ce   :  { %v1461_v60 = vpop.f32.mrf.mxu1 }
 0x2cf   :  { %v1462_v3 = vadd.f32 %v1461_v60, %v1460_v52  ;;  %v1156_v5 = vmul.f32 %v1126_v58, %v1126_v58  ;;  %v1141_v20 = vadd.f32 %v1140_v6, %v1126_v58  ;;  %p1601_p4 = pnand %p1600_p3, %p1594_p0 }
 0x2d0   :  { %v1463_v4 = vpop.f32.mrf.mxu1 }
 0x2d1   :  { %v1131_v7 = vadd.f32 %v1534_v51, %v1462_v3  ;;  %v1163_v34 = vadd.f32 %v1162_v10, %v1156_v5 }
 0x2d2   :  { %v1464_v8 = vpop.f32.mrf.mxu1 }
 0x2d3   :  { %v1157_v11 = vmul.f32 %v1131_v7, %v1131_v7  ;;  %v1465_v12 = vadd.f32 %v1464_v8, %v1463_v4  ;;  %v1142_v13 = vadd.f32 %v1141_v20, %v1131_v7 }
 0x2d5   :  { %v1134_v14 = vadd.f32 %v1535_v36, %v1465_v12  ;;  %v1164_v15 = vadd.f32 %v1163_v34, %v1157_v11 }
 0x2d7   :  { %v1143_v16 = vadd.f32 %v1142_v13, %v1134_v14  ;;  %v1158_v46 = vmul.f32 %v1134_v14, %v1134_v14 }
 0x2d9   :  { %v1144_v42 = vrot.slane %v1143_v16, 4  ;;  %v1165_v17 = vadd.f32 %v1164_v15, %v1158_v46 }
 0x2db   :  { %v1145_v18 = vadd.f32 %v1144_v42, %v1143_v16  ;;  %v1166_v21 = vrot.slane %v1165_v17, 4 }
 0x2dd   :  { %v1146_v22 = vrot.slane %v1145_v18, 2  ;;  %v1167_v23 = vadd.f32 %v1166_v21, %v1165_v17 }
 0x2df   :  { %v1147_v24 = vadd.f32 %v1146_v22, %v1145_v18  ;;  %v1168_v25 = vrot.slane %v1167_v23, 2 }
 0x2e1   :  { %v1148_v26 = vrot.slane %v1147_v24, 1  ;;  %v1169_v55 = vadd.f32 %v1168_v25, %v1167_v23 }
 0x2e3   :  { %v1149_v27 = vadd.f32 %v1148_v26, %v1147_v24  ;;  %v1170_v29 = vrot.slane %v1169_v55, 1 }
 0x2e5   :  { %v1150_v51 = vmul.f32 0.015625, %v1149_v27  ;;  %v1171_v30 = vadd.f32 %v1170_v29, %v1169_v55 }
 0x2e7   :  { %v1172_v49 = vmul.f32 0.015625, %v1171_v30  ;;  %v1173_v31 = vmul.f32 %v1150_v51, %v1150_v51 }
 0x2e9   :  { %v1174_v39 = vsub.f32 %v1172_v49, %v1173_v31 }
 0x2eb   :  { %v1175_v53 = vmax.f32 %v1174_v39, 0.0 }
 0x2ed   :  { %v1177_v32 = vadd.f32 1e-05, %v1175_v53 }
 0x2ef   :  { %1591 = vrsqrt.f32 %v1177_v32 }
 0x2fc   :  { %v1592_v33 = vpop.eup %1591 }
 0x2fd   :  { %v1179_v9 = vmul.f32 %v1592_v33, %v1176_v59 }
 0x2ff   :  { %v1181_v36 = vmul.f32 %v1179_v9, %v1150_v51  ;;  %v1187_v37 = vrot.slane %v1179_v9, %v2029_v63 }
 0x301   :  { %v1182_v40 = vsub.f32 %v1180_v35, %v1181_v36  ;;  %v1196_v43 = vmul.f32 %v1187_v37, %v1134_v14  ;;  %v1189_v38 = vmul.f32 %v1187_v37, %v2091_v1  ;;  %v1190_v45 = vmul.f32 %v1187_v37, %v2089_v62 }
 0x302   :  { %v1191_v48 = vmul.f32 %v1187_v37, %v2093_v19  ;;  %v1192_v50 = vmul.f32 %v1187_v37, %v2097_v41  ;;  %v1193_v52 = vmul.f32 %v1187_v37, %v2105_v47  ;;  %v1194_v54 = vmul.f32 %v1187_v37, %v1126_v58 }
 0x303   :  { %v1201_v44 = vrot.slane %v1182_v40, %v2029_v63  ;;  %v1195_v57 = vmul.f32 %v1187_v37, %v1131_v7 }
 0x305   :  { %v1210_v56 = vadd.f32 %v1201_v44, %v1196_v43  ;;  %v1203_v60 = vadd.f32 %v1201_v44, %v1189_v38  ;;  %v1204_v61 = vadd.f32 %v1201_v44, %v1190_v45  ;;  %v1205_v0 = vadd.f32 %v1201_v44, %v1191_v48 }
 0x306   :  { %v1206_v2 = vadd.f32 %v1201_v44, %v1192_v50  ;;  %v1207_v63 = vadd.f32 %v1201_v44, %v1193_v52  ;;  %v1208_v3 = vadd.f32 %v1201_v44, %v1194_v54  ;;  %v1209_v1 = vadd.f32 %v1201_v44, %v1195_v57 }
 0x307   :  { %v1218_v4 = vmax.f32 %v1210_v56, 0.0  ;;  %v1211_v62 = vmax.f32 %v1203_v60, 0.0  ;;  %v1212_v28 = vmax.f32 %v1204_v61, 0.0  ;;  %v1213_v19 = vmax.f32 %v1205_v0, 0.0 }
 0x308   :  { %v1214_v6 = vmax.f32 %v1206_v2, 0.0  ;;  %v1215_v41 = vmax.f32 %v1207_v63, 0.0  ;;  %v1216_v5 = vmax.f32 %v1208_v3, 0.0  ;;  %v1217_v47 = vmax.f32 %v1209_v1, 0.0 }
 0x309   :  { %1227 = vst.msk [vmem:[#allocation2 + $0x38] sm:$0xff] %vm1219_vm3, %v1218_v4  ;;  %1220 = vst.msk [vmem:[#allocation2] sm:$0xff] %vm1219_vm3, %v1211_v62 }
 0x30a   :  { %1221 = vst.msk [vmem:[#allocation2 + $0x8] sm:$0xff] %vm1219_vm3, %v1212_v28  ;;  %1222 = vst.msk [vmem:[#allocation2 + $0x10] sm:$0xff] %vm1219_vm3, %v1213_v19 }
 0x30b   :  { %1223 = vst.msk [vmem:[#allocation2 + $0x18] sm:$0xff] %vm1219_vm3, %v1214_v6  ;;  %1224 = vst.msk [vmem:[#allocation2 + $0x20] sm:$0xff] %vm1219_vm3, %v1215_v41 }
 0x30c   :  { %1225 = vst.msk [vmem:[#allocation2 + $0x28] sm:$0xff] %vm1219_vm3, %v1216_v5  ;;  %1226 = vst.msk [vmem:[#allocation2 + $0x30] sm:$0xff] %vm1219_vm3, %v1217_v47 }
 0x30d   :  { %1604 = shalt.err (!%p1601_p4)
}
 0x30e   :  { %s1617_s11 = smov 128   ;;  %s1618_s12 = smov 8  }
 0x30f   :  { %1239 = dma.vmem_to_hbm [thread:$0]  %s1234_s8, 1024, %s2147_s9, [#allocation3], %s1617_s11, %s1617_s11, %s1618_s12  }
 0x310   :  { %1613 = dma.done.wait [#allocation3], 1024  }
 0x311   :  { %1614 = vsyncadd [#allocation3], 4294966272 }
 0x312   :  { %1243 = vsyncpa [#allocation3], 1 }

</bundles_post_ra>
